<compile_context>
chip_gen: v7x
topology: tpu7x:2x2x1
jax: 0.10.0
libtpu: 0.0.40
codegen_flags: <defaults>
</compile_context>

<pallas_src>
import functools

import jax
import jax.numpy as jnp
from jax import lax
from jax.experimental import pallas as pl
from jax.experimental.pallas import tpu as pltpu


# ---------------------------------------------------------------------------
# Kernel 1: row-tiled linear  y = x @ w + b   (message pre-transform)
# ---------------------------------------------------------------------------

def _linear_kernel(x_ref, w_ref, b_ref, o_ref):
    y = jnp.dot(x_ref[...], w_ref[...], preferred_element_type=jnp.float32)
    o_ref[...] = (y + b_ref[...]).astype(o_ref.dtype)


def linear_rows(x, w, b=None, *, tm=512):
    M, K = x.shape
    Dout = w.shape[1]
    if b is None:
        b = jnp.zeros((1, Dout), x.dtype)
    tm_eff = M if M <= tm else tm
    grid_m = pl.cdiv(M, tm_eff)          # ragged tail handled by masked boundary blocks
    return pl.pallas_call(
        _linear_kernel,
        out_shape=jax.ShapeDtypeStruct((M, Dout), x.dtype),
        grid=(grid_m,),
        in_specs=[
            pl.BlockSpec((tm_eff, K), lambda i: (i, 0)),
            pl.BlockSpec((K, Dout), lambda i: (0, 0)),       # resident weights
            pl.BlockSpec((1, Dout), lambda i: (0, 0)),
        ],
        out_specs=pl.BlockSpec((tm_eff, Dout), lambda i: (i, 0)),
        compiler_params=pltpu.CompilerParams(dimension_semantics=("parallel",)),
    )(x, w, b)


# ---------------------------------------------------------------------------
# Kernel 2: batched-edge segment sum (fn.mean numerator), VPU-only
# ---------------------------------------------------------------------------

def _segment_sum_kernel(n_edges, te, s_rows,
                        src_ref, dst_ref, nmsg_ref, emsg_ref, out_ref):
    blk = pl.program_id(0)

    @pl.when(blk == 0)
    def _():
        out_ref[...] = jnp.zeros_like(out_ref)

    base = blk * te
    n_valid = jnp.minimum(te, n_edges - base)                # ragged last edge batch

    def body(j, carry):
        e = base + j
        src_row = src_ref[e] * s_rows
        dst_row = dst_ref[e] * s_rows
        m = (nmsg_ref[pl.ds(src_row, s_rows), :] +           # lane-dense (S,128) gather
             emsg_ref[pl.ds(j * s_rows, s_rows), :])
        out_ref[pl.ds(dst_row, s_rows), :] = out_ref[pl.ds(dst_row, s_rows), :] + m
        return carry

    lax.fori_loop(0, n_valid, body, 0)


def edge_segment_sum(src, dst, nmsg, emsg, n_nodes, s_rows, *, te=256):
    """out[n*S:(n+1)*S] = sum over edges (u->n) of (nmsg[u*S:(u+1)*S] + emsg[e*S:(e+1)*S])."""
    n_edges = src.shape[0]
    D = nmsg.shape[1]
    te_eff = n_edges if n_edges <= te else te
    grid_e = pl.cdiv(n_edges, te_eff)

    # Resident node messages + resident accumulator + double-buffered edge-message blocks.
    vmem_need = 4 * (4 * n_nodes * s_rows * D + 4 * te_eff * s_rows * D) + (4 << 20)
    vmem_limit = int(min(max(vmem_need, 32 << 20), 120 << 20))

    grid_spec = pltpu.PrefetchScalarGridSpec(
        num_scalar_prefetch=2,                               # src, dst -> SMEM
        grid=(grid_e,),
        in_specs=[
            pl.BlockSpec((n_nodes * s_rows, D), lambda i, sp, dp: (0, 0)),  # resident nmsg
            pl.BlockSpec((te_eff * s_rows, D), lambda i, sp, dp: (i, 0)),   # pipelined emsg
        ],
        out_specs=pl.BlockSpec((n_nodes * s_rows, D), lambda i, sp, dp: (0, 0)),
    )
    return pl.pallas_call(
        functools.partial(_segment_sum_kernel, n_edges, te_eff, s_rows),
        out_shape=jax.ShapeDtypeStruct((n_nodes * s_rows, D), jnp.float32),  # f32 accumulation
        grid_spec=grid_spec,
        compiler_params=pltpu.CompilerParams(
            dimension_semantics=("arbitrary",),              # serial reduction into resident out
            vmem_limit_bytes=vmem_limit,
        ),
    )(src, dst, nmsg, emsg)


# ---------------------------------------------------------------------------
# Kernel 3: fused  W_apply(concat) + 1/deg scaling + bias + ReLU
# ---------------------------------------------------------------------------

def _apply_relu_kernel(x_ref, h_ref, inv_ref, ws_ref, wn_ref, b_ref, o_ref):
    h_mean = h_ref[...] * inv_ref[...]                       # 1/deg once per row, not per edge
    y = jnp.dot(x_ref[...], ws_ref[...], preferred_element_type=jnp.float32)
    y = y + jnp.dot(h_mean, wn_ref[...], preferred_element_type=jnp.float32)
    o_ref[...] = jnp.maximum(y + b_ref[...], 0.0).astype(o_ref.dtype)


def fused_apply_relu(x, h_sum, inv_rows, w_self, w_neigh, b, *, tm=512):
    M, Din = x.shape
    Dmsg = h_sum.shape[1]
    Dout = w_self.shape[1]
    tm_eff = M if M <= tm else tm
    grid_m = pl.cdiv(M, tm_eff)
    return pl.pallas_call(
        _apply_relu_kernel,
        out_shape=jax.ShapeDtypeStruct((M, Dout), x.dtype),
        grid=(grid_m,),
        in_specs=[
            pl.BlockSpec((tm_eff, Din), lambda i: (i, 0)),
            pl.BlockSpec((tm_eff, Dmsg), lambda i: (i, 0)),
            pl.BlockSpec((tm_eff, 1), lambda i: (i, 0)),     # per-row 1/deg column
            pl.BlockSpec((Din, Dout), lambda i: (0, 0)),
            pl.BlockSpec((Dmsg, Dout), lambda i: (0, 0)),
            pl.BlockSpec((1, Dout), lambda i: (0, 0)),
        ],
        out_specs=pl.BlockSpec((tm_eff, Dout), lambda i: (i, 0)),
        compiler_params=pltpu.CompilerParams(dimension_semantics=("parallel",)),
    )(x, h_sum, inv_rows, w_self, w_neigh, b)


# ---------------------------------------------------------------------------
# Kernel 4: final nfeats.sum(1)
# ---------------------------------------------------------------------------

def _sum_s_kernel(x_ref, o_ref):
    o_ref[...] = jnp.sum(x_ref[...], axis=1).astype(o_ref.dtype)


def sum_over_s(x, *, tn=512):
    N, S, D = x.shape
    tn_eff = N if N <= tn else tn
    grid_n = pl.cdiv(N, tn_eff)
    return pl.pallas_call(
        _sum_s_kernel,
        out_shape=jax.ShapeDtypeStruct((N, D), x.dtype),
        grid=(grid_n,),
        in_specs=[pl.BlockSpec((tn_eff, S, D), lambda i: (i, 0, 0))],
        out_specs=pl.BlockSpec((tn_eff, D), lambda i: (i, 0)),
        compiler_params=pltpu.CompilerParams(dimension_semantics=("parallel",)),
    )(x)


# ---------------------------------------------------------------------------
# SAGE model glue
# ---------------------------------------------------------------------------

def sage_layer(src, dst, inv_rows, nfeats_flat, efeats_flat, n_nodes, s_rows, params):
    (w_msg_node, w_msg_edge, b_msg, w_app_self, w_app_neigh, b_app) = params

    # Pre-transform once per node row / edge row (proper MXU matmuls, no per-edge dots).
    nmsg = linear_rows(nfeats_flat, w_msg_node)              # (N*S, Dmsg)
    emsg = linear_rows(efeats_flat, w_msg_edge, b_msg)       # (E*S, Dmsg)

    # fn.mean numerator: batched-edge segment sum over destinations.
    h_sum = edge_segment_sum(src, dst, nmsg, emsg, n_nodes, s_rows)

    # relu(W_apply([h, mean])) with 1/deg folded in; concat eliminated via split weights.
    return fused_apply_relu(nfeats_flat, h_sum, inv_rows, w_app_self, w_app_neigh, b_app)


def sage_forward(src, dst, nfeats, efeats, params1, params2, ndim_out):
    N, S, Din = nfeats.shape
    E, _, Edim = efeats.shape
    deg = jnp.zeros((N,), jnp.float32).at[dst].add(1.0)
    inv_deg = jnp.where(deg > 0, 1.0 / jnp.maximum(deg, 1.0), 0.0)   # DGL mean: 0 if no in-edges
    inv_rows = jnp.repeat(inv_deg, S).reshape(N * S, 1)

    nf = nfeats.reshape(N * S, Din)
    ef = efeats.reshape(E * S, Edim)

    h = sage_layer(src, dst, inv_rows, nf, ef, N, S, params1)        # (N*S, 128)
    # TODO(synk): nn.Dropout is identity in eval mode; training-mode dropout omitted.
    h = sage_layer(src, dst, inv_rows, h, ef, N, S, params2)         # (N*S, 128) padded
    out = sum_over_s(h.reshape(N, S, -1))                            # (N, 128) lane-dense
    return out[:, :ndim_out]                                         # drop the zero padding


# ---------------------------------------------------------------------------
# Parameter construction (mirrors nn.Linear on the concatenated input, then
# splits the weight rows so the kernels never need the concat).
# ---------------------------------------------------------------------------

def init_linear(key, d_in, d_out, dtype=jnp.float32):
    kw, kb = jax.random.split(key)
    bound = 1.0 / jnp.sqrt(jnp.asarray(d_in, dtype))
    w = jax.random.uniform(kw, (d_in, d_out), dtype, -bound, bound)   # stored [in, out]
    b = jax.random.uniform(kb, (1, d_out), dtype, -bound, bound)
    return w, b


def make_layer_params(key, ndim_in, edim, ndim_out, dout_pad=None):
    k1, k2 = jax.random.split(key)
    w_msg, b_msg = init_linear(k1, ndim_in + edim, ndim_out)
    w_app, b_app = init_linear(k2, ndim_in + ndim_out, ndim_out)

    # split concat weights -> identical math, no concat materialization
    w_msg_node, w_msg_edge = w_msg[:ndim_in], w_msg[ndim_in:]
    w_app_self, w_app_neigh = w_app[:ndim_in], w_app[ndim_in:]

    # zero-pad the output dim to a lane-dense multiple of 128 (padding is exact:
    # extra cols/rows are zero so results are unchanged and sliced off at the end)
    if dout_pad is not None and dout_pad != ndim_out:
        pad = dout_pad - ndim_out
        pad_cols = lambda a: jnp.pad(a, ((0, 0), (0, pad)))
        w_msg_node, w_msg_edge, b_msg = map(pad_cols, (w_msg_node, w_msg_edge, b_msg))
        w_app_self, b_app = pad_cols(w_app_self), pad_cols(b_app)
        w_app_neigh = jnp.pad(w_app_neigh, ((0, pad), (0, pad)))
    return (w_msg_node, w_msg_edge, b_msg, w_app_self, w_app_neigh, b_app)


# ---------------------------------------------------------------------------
# Pure-JAX reference (for correctness check only)
# ---------------------------------------------------------------------------

def sage_reference(src, dst, nfeats, efeats, params1, params2, ndim_out):
    def layer(nf, ef, params):
        wn, we, bm, ws, wa, ba = params
        m = nf[src] @ wn + ef @ we + bm                      # (E, S, Dmsg)
        n = nf.shape[0]
        deg = jnp.zeros((n,), jnp.float32).at[dst].add(1.0)
        msum = jnp.zeros((n, nf.shape[1], wn.shape[1]), jnp.float32).at[dst].add(m)
        h_neigh = jnp.where(deg[:, None, None] > 0,
                            msum / jnp.maximum(deg, 1.0)[:, None, None], 0.0)
        return jax.nn.relu(nf @ ws + h_neigh @ wa + ba)

    h = layer(nfeats, efeats, params1)
    h = layer(h, efeats, params2)
    return h.sum(axis=1)[:, :ndim_out]


# ----------------------------------- main -----------------------------------

if __name__ == "__main__":
    key = jax.random.PRNGKey(0)
    N, E, S = 6, 12, 2                 # nodes, edges, middle "seq" dim
    ndim_in, edim, ndim_out = 16, 8, 32
    hidden = 128                       # fixed by SAGE.__init__

    k_graph, k_nf, k_ef, kl1, kl2 = jax.random.split(key, 5)
    ks, kd = jax.random.split(k_graph)
    src = jax.random.randint(ks, (E,), 0, N, dtype=jnp.int32)
    dst = jax.random.randint(kd, (E,), 0, N, dtype=jnp.int32)

    nfeats = jax.random.normal(k_nf, (N, S, ndim_in), jnp.float32)
    efeats = jax.random.normal(k_ef, (E, S, edim), jnp.float32)

    # Layer 1: W_msg [16+8 -> 128], W_apply [16+128 -> 128]   (already lane-dense)
    params1 = make_layer_params(kl1, ndim_in, edim, hidden)
    # Layer 2: W_msg [128+8 -> 32], W_apply [128+32 -> 32], padded 32 -> 128
    params2 = make_layer_params(kl2, hidden, edim, ndim_out, dout_pad=128)

    @jax.jit
    def run(src, dst, nfeats, efeats, params1, params2):
        return sage_forward(src, dst, nfeats, efeats, params1, params2, ndim_out)

    out = run(src, dst, nfeats, efeats, params1, params2)
    jax.block_until_ready(out)
    assert out.shape == (N, ndim_out), out.shape

    ref = sage_reference(src, dst, nfeats, efeats, params1, params2, ndim_out)
    assert jnp.allclose(out, ref, rtol=2e-2, atol=2e-2), \
        float(jnp.max(jnp.abs(out - ref)))
    print("KERNEL_OK")
</pallas_src>

<mosaic_0001>
module attributes {stable_mosaic.version = 11 : i64} {
  func.func @_linear_kernel(%arg0: i32, %arg1: memref<12x16xf32, #tpu.memory_space<vmem>>, %arg2: memref<16x128xf32, #tpu.memory_space<vmem>>, %arg3: memref<1x128xf32, #tpu.memory_space<vmem>>, %arg4: memref<12x128xf32, #tpu.memory_space<vmem>>) attributes {dimension_semantics = [#tpu.dimension_semantics<parallel>], iteration_bounds = array<i64: 1>, scalar_prefetch = 0 : i64, scratch_operands = 0 : i64, tpu.core_type = #tpu.core_type<tc>, window_params = [{transform_indices = @transform_0, window_bounds = array<i64: 12, 16>}, {pipeline_mode = #tpu.pipeline_mode<synchronous>, transform_indices = @transform_1, window_bounds = array<i64: 16, 128>}, {pipeline_mode = #tpu.pipeline_mode<synchronous>, transform_indices = @transform_2, window_bounds = array<i64: 1, 128>}, {transform_indices = @transform_3, window_bounds = array<i64: 12, 128>}]} {
    %c0 = arith.constant 0 : index
    %c0_0 = arith.constant 0 : index
    %0 = vector.load %arg1[%c0, %c0_0] : memref<12x16xf32, #tpu.memory_space<vmem>>, vector<12x16xf32>
    %c0_1 = arith.constant 0 : index
    %c0_2 = arith.constant 0 : index
    %1 = vector.load %arg2[%c0_1, %c0_2] : memref<16x128xf32, #tpu.memory_space<vmem>>, vector<16x128xf32>
    %cst = arith.constant dense<0.000000e+00> : vector<12x128xf32>
    %2 = tpu.matmul %0, %1, %cst {dimension_numbers = #tpu.dot_dimension_numbers<[1], [0], [0], [1], [0, 0, 1, 1], [], []>} : vector<12x16xf32>, vector<16x128xf32>, vector<12x128xf32> -> vector<12x128xf32>
    %c0_3 = arith.constant 0 : index
    %c0_4 = arith.constant 0 : index
    %3 = vector.load %arg3[%c0_3, %c0_4] : memref<1x128xf32, #tpu.memory_space<vmem>>, vector<1x128xf32>
    %4 = vector.broadcast %3 : vector<1x128xf32> to vector<12x128xf32>
    %5 = arith.addf %2, %4 : vector<12x128xf32>
    %c0_5 = arith.constant 0 : index
    %c0_6 = arith.constant 0 : index
    %6 = vector.load %arg4[%c0_5, %c0_6] : memref<12x128xf32, #tpu.memory_space<vmem>>, vector<12x128xf32>
    tpu.vector_store %arg4[%c0_5, %c0_6], %5 {strides = array<i32>} : memref<12x128xf32, #tpu.memory_space<vmem>>, vector<12x128xf32>,
    return
  }
  func.func @transform_0(%arg0: i32) -> (i32, i32) {
    %c0_i32 = arith.constant 0 : i32
    %c0_i32_0 = arith.constant 0 : i32
    return %arg0, %c0_i32 : i32, i32
  }
  func.func @transform_1(%arg0: i32) -> (i32, i32) {
    %c0_i32 = arith.constant 0 : i32
    %c0_i32_0 = arith.constant 0 : i32
    %c0_i32_1 = arith.constant 0 : i32
    return %c0_i32, %c0_i32_0 : i32, i32
  }
  func.func @transform_2(%arg0: i32) -> (i32, i32) {
    %c0_i32 = arith.constant 0 : i32
    %c0_i32_0 = arith.constant 0 : i32
    %c0_i32_1 = arith.constant 0 : i32
    return %c0_i32, %c0_i32_0 : i32, i32
  }
  func.func @transform_3(%arg0: i32) -> (i32, i32) {
    %c0_i32 = arith.constant 0 : i32
    %c0_i32_0 = arith.constant 0 : i32
    return %arg0, %c0_i32 : i32, i32
  }
}

module attributes {stable_mosaic.version = 11 : i64} {
  func.func @_segment_sum_kernel(%arg0: i32, %arg1: memref<12xi32, #tpu.memory_space<smem>>, %arg2: memref<12xi32, #tpu.memory_space<smem>>, %arg3: memref<12x128xf32, #tpu.memory_space<vmem>>, %arg4: memref<24x128xf32, #tpu.memory_space<vmem>>, %arg5: memref<12x128xf32, #tpu.memory_space<vmem>>) attributes {dimension_semantics = [#tpu.dimension_semantics<arbitrary>], iteration_bounds = array<i64: 1>, scalar_prefetch = 2 : i64, scratch_operands = 0 : i64, tpu.core_type = #tpu.core_type<tc>, window_params = [{pipeline_mode = #tpu.pipeline_mode<synchronous>, transform_indices = @transform_0, window_bounds = array<i64: 12, 128>}, {transform_indices = @transform_1, window_bounds = array<i64: 24, 128>}, {pipeline_mode = #tpu.pipeline_mode<synchronous>, transform_indices = @transform_2, window_bounds = array<i64: 12, 128>}]} {
    %c0_i32 = arith.constant 0 : i32
    %0 = arith.cmpi eq, %arg0, %c0_i32 : i32
    %1 = arith.extui %0 : i1 to i32
    %c0_i32_0 = arith.constant 0 : i32
    %2 = arith.cmpi ne, %1, %c0_i32_0 : i32
    scf.if %2 {
      %cst = arith.constant 0.000000e+00 : f32
      %8 = vector.broadcast %cst : f32 to vector<12x128xf32>
      %c0 = arith.constant 0 : index
      %c0_5 = arith.constant 0 : index
      %9 = vector.load %arg5[%c0, %c0_5] : memref<12x128xf32, #tpu.memory_space<vmem>>, vector<12x128xf32>
      tpu.vector_store %arg5[%c0, %c0_5], %8 {strides = array<i32>} : memref<12x128xf32, #tpu.memory_space<vmem>>, vector<12x128xf32>,
    } else {
    }
    %c12_i32 = arith.constant 12 : i32
    %3 = arith.muli %arg0, %c12_i32 : i32
    %c12_i32_1 = arith.constant 12 : i32
    %4 = arith.subi %c12_i32_1, %3 : i32
    %c12_i32_2 = arith.constant 12 : i32
    %5 = arith.minsi %c12_i32_2, %4 : i32
    %c0_i32_3 = arith.constant 0 : i32
    %c0_i32_4 = arith.constant 0 : i32
    %6 = arith.subi %5, %c0_i32_4 : i32
    %7 = arith.addi %c0_i32_4, %6 : i32
    %c1_i32 = arith.constant 1 : i32
    scf.for %arg6 = %c0_i32_4 to %7 step %c1_i32  : i32 {
      %8 = arith.addi %3, %arg6 : i32
      %9 = arith.index_cast %8 : i32 to index
      %10 = memref.load %arg1[%9] : memref<12xi32, #tpu.memory_space<smem>>
      %c2_i32 = arith.constant 2 : i32
      %11 = arith.muli %10, %c2_i32 : i32
      %12 = arith.index_cast %8 : i32 to index
      %13 = memref.load %arg2[%12] : memref<12xi32, #tpu.memory_space<smem>>
      %c2_i32_5 = arith.constant 2 : i32
      %14 = arith.muli %13, %c2_i32_5 : i32
      %15 = arith.index_cast %11 : i32 to index
      %c0 = arith.constant 0 : index
      %16 = vector.load %arg3[%15, %c0] : memref<12x128xf32, #tpu.memory_space<vmem>>, vector<2x128xf32>
      %c2_i32_6 = arith.constant 2 : i32
      %17 = arith.muli %arg6, %c2_i32_6 : i32
      %18 = arith.index_cast %17 : i32 to index
      %c0_7 = arith.constant 0 : index
      %19 = vector.load %arg4[%18, %c0_7] : memref<24x128xf32, #tpu.memory_space<vmem>>, vector<2x128xf32>
      %20 = arith.addf %16, %19 : vector<2x128xf32>
      %21 = arith.index_cast %14 : i32 to index
      %c0_8 = arith.constant 0 : index
      %22 = vector.load %arg5[%21, %c0_8] : memref<12x128xf32, #tpu.memory_space<vmem>>, vector<2x128xf32>
      %23 = arith.addf %22, %20 : vector<2x128xf32>
      %24 = arith.index_cast %14 : i32 to index
      %c0_9 = arith.constant 0 : index
      %25 = vector.load %arg5[%24, %c0_9] : memref<12x128xf32, #tpu.memory_space<vmem>>, vector<2x128xf32>
      tpu.vector_store %arg5[%24, %c0_9], %23 {strides = array<i32>} : memref<12x128xf32, #tpu.memory_space<vmem>>, vector<2x128xf32>,
    }
    return
  }
  func.func @transform_0(%arg0: i32, %arg1: memref<12xi32, #tpu.memory_space<smem>>, %arg2: memref<12xi32, #tpu.memory_space<smem>>) -> (i32, i32) {
    %c0_i32 = arith.constant 0 : i32
    %c0_i32_0 = arith.constant 0 : i32
    %c0_i32_1 = arith.constant 0 : i32
    return %c0_i32, %c0_i32_0 : i32, i32
  }
  func.func @transform_1(%arg0: i32, %arg1: memref<12xi32, #tpu.memory_space<smem>>, %arg2: memref<12xi32, #tpu.memory_space<smem>>) -> (i32, i32) {
    %c0_i32 = arith.constant 0 : i32
    %c0_i32_0 = arith.constant 0 : i32
    return %arg0, %c0_i32 : i32, i32
  }
  func.func @transform_2(%arg0: i32, %arg1: memref<12xi32, #tpu.memory_space<smem>>, %arg2: memref<12xi32, #tpu.memory_space<smem>>) -> (i32, i32) {
    %c0_i32 = arith.constant 0 : i32
    %c0_i32_0 = arith.constant 0 : i32
    %c0_i32_1 = arith.constant 0 : i32
    return %c0_i32, %c0_i32_0 : i32, i32
  }
}

module attributes {stable_mosaic.version = 11 : i64} {
  func.func @_linear_kernel(%arg0: i32, %arg1: memref<24x8xf32, #tpu.memory_space<vmem>>, %arg2: memref<8x128xf32, #tpu.memory_space<vmem>>, %arg3: memref<1x128xf32, #tpu.memory_space<vmem>>, %arg4: memref<24x128xf32, #tpu.memory_space<vmem>>) attributes {dimension_semantics = [#tpu.dimension_semantics<parallel>], iteration_bounds = array<i64: 1>, scalar_prefetch = 0 : i64, scratch_operands = 0 : i64, tpu.core_type = #tpu.core_type<tc>, window_params = [{transform_indices = @transform_0, window_bounds = array<i64: 24, 8>}, {pipeline_mode = #tpu.pipeline_mode<synchronous>, transform_indices = @transform_1, window_bounds = array<i64: 8, 128>}, {pipeline_mode = #tpu.pipeline_mode<synchronous>, transform_indices = @transform_2, window_bounds = array<i64: 1, 128>}, {transform_indices = @transform_3, window_bounds = array<i64: 24, 128>}]} {
    %c0 = arith.constant 0 : index
    %c0_0 = arith.constant 0 : index
    %0 = vector.load %arg1[%c0, %c0_0] : memref<24x8xf32, #tpu.memory_space<vmem>>, vector<24x8xf32>
    %c0_1 = arith.constant 0 : index
    %c0_2 = arith.constant 0 : index
    %1 = vector.load %arg2[%c0_1, %c0_2] : memref<8x128xf32, #tpu.memory_space<vmem>>, vector<8x128xf32>
    %cst = arith.constant dense<0.000000e+00> : vector<24x128xf32>
    %2 = tpu.matmul %0, %1, %cst {dimension_numbers = #tpu.dot_dimension_numbers<[1], [0], [0], [1], [0, 0, 1, 1], [], []>} : vector<24x8xf32>, vector<8x128xf32>, vector<24x128xf32> -> vector<24x128xf32>
    %c0_3 = arith.constant 0 : index
    %c0_4 = arith.constant 0 : index
    %3 = vector.load %arg3[%c0_3, %c0_4] : memref<1x128xf32, #tpu.memory_space<vmem>>, vector<1x128xf32>
    %4 = vector.broadcast %3 : vector<1x128xf32> to vector<24x128xf32>
    %5 = arith.addf %2, %4 : vector<24x128xf32>
    %c0_5 = arith.constant 0 : index
    %c0_6 = arith.constant 0 : index
    %6 = vector.load %arg4[%c0_5, %c0_6] : memref<24x128xf32, #tpu.memory_space<vmem>>, vector<24x128xf32>
    tpu.vector_store %arg4[%c0_5, %c0_6], %5 {strides = array<i32>} : memref<24x128xf32, #tpu.memory_space<vmem>>, vector<24x128xf32>,
    return
  }
  func.func @transform_0(%arg0: i32) -> (i32, i32) {
    %c0_i32 = arith.constant 0 : i32
    %c0_i32_0 = arith.constant 0 : i32
    return %arg0, %c0_i32 : i32, i32
  }
  func.func @transform_1(%arg0: i32) -> (i32, i32) {
    %c0_i32 = arith.constant 0 : i32
    %c0_i32_0 = arith.constant 0 : i32
    %c0_i32_1 = arith.constant 0 : i32
    return %c0_i32, %c0_i32_0 : i32, i32
  }
  func.func @transform_2(%arg0: i32) -> (i32, i32) {
    %c0_i32 = arith.constant 0 : i32
    %c0_i32_0 = arith.constant 0 : i32
    %c0_i32_1 = arith.constant 0 : i32
    return %c0_i32, %c0_i32_0 : i32, i32
  }
  func.func @transform_3(%arg0: i32) -> (i32, i32) {
    %c0_i32 = arith.constant 0 : i32
    %c0_i32_0 = arith.constant 0 : i32
    return %arg0, %c0_i32 : i32, i32
  }
}

module attributes {stable_mosaic.version = 11 : i64} {
  func.func @_linear_kernel(%arg0: i32, %arg1: memref<12x128xf32, #tpu.memory_space<vmem>>, %arg2: memref<128x128xf32, #tpu.memory_space<vmem>>, %arg3: memref<1x128xf32, #tpu.memory_space<vmem>>, %arg4: memref<12x128xf32, #tpu.memory_space<vmem>>) attributes {dimension_semantics = [#tpu.dimension_semantics<parallel>], iteration_bounds = array<i64: 1>, scalar_prefetch = 0 : i64, scratch_operands = 0 : i64, tpu.core_type = #tpu.core_type<tc>, window_params = [{transform_indices = @transform_0, window_bounds = array<i64: 12, 128>}, {pipeline_mode = #tpu.pipeline_mode<synchronous>, transform_indices = @transform_1, window_bounds = array<i64: 128, 128>}, {pipeline_mode = #tpu.pipeline_mode<synchronous>, transform_indices = @transform_2, window_bounds = array<i64: 1, 128>}, {transform_indices = @transform_3, window_bounds = array<i64: 12, 128>}]} {
    %c0 = arith.constant 0 : index
    %c0_0 = arith.constant 0 : index
    %0 = vector.load %arg1[%c0, %c0_0] : memref<12x128xf32, #tpu.memory_space<vmem>>, vector<12x128xf32>
    %c0_1 = arith.constant 0 : index
    %c0_2 = arith.constant 0 : index
    %1 = vector.load %arg2[%c0_1, %c0_2] : memref<128x128xf32, #tpu.memory_space<vmem>>, vector<128x128xf32>
    %cst = arith.constant dense<0.000000e+00> : vector<12x128xf32>
    %2 = tpu.matmul %0, %1, %cst {dimension_numbers = #tpu.dot_dimension_numbers<[1], [0], [0], [1], [0, 0, 1, 1], [], []>} : vector<12x128xf32>, vector<128x128xf32>, vector<12x128xf32> -> vector<12x128xf32>
    %c0_3 = arith.constant 0 : index
    %c0_4 = arith.constant 0 : index
    %3 = vector.load %arg3[%c0_3, %c0_4] : memref<1x128xf32, #tpu.memory_space<vmem>>, vector<1x128xf32>
    %4 = vector.broadcast %3 : vector<1x128xf32> to vector<12x128xf32>
    %5 = arith.addf %2, %4 : vector<12x128xf32>
    %c0_5 = arith.constant 0 : index
    %c0_6 = arith.constant 0 : index
    %6 = vector.load %arg4[%c0_5, %c0_6] : memref<12x128xf32, #tpu.memory_space<vmem>>, vector<12x128xf32>
    tpu.vector_store %arg4[%c0_5, %c0_6], %5 {strides = array<i32>} : memref<12x128xf32, #tpu.memory_space<vmem>>, vector<12x128xf32>,
    return
  }
  func.func @transform_0(%arg0: i32) -> (i32, i32) {
    %c0_i32 = arith.constant 0 : i32
    %c0_i32_0 = arith.constant 0 : i32
    return %arg0, %c0_i32 : i32, i32
  }
  func.func @transform_1(%arg0: i32) -> (i32, i32) {
    %c0_i32 = arith.constant 0 : i32
    %c0_i32_0 = arith.constant 0 : i32
    %c0_i32_1 = arith.constant 0 : i32
    return %c0_i32, %c0_i32_0 : i32, i32
  }
  func.func @transform_2(%arg0: i32) -> (i32, i32) {
    %c0_i32 = arith.constant 0 : i32
    %c0_i32_0 = arith.constant 0 : i32
    %c0_i32_1 = arith.constant 0 : i32
    return %c0_i32, %c0_i32_0 : i32, i32
  }
  func.func @transform_3(%arg0: i32) -> (i32, i32) {
    %c0_i32 = arith.constant 0 : i32
    %c0_i32_0 = arith.constant 0 : i32
    return %arg0, %c0_i32 : i32, i32
  }
}

module attributes {stable_mosaic.version = 11 : i64} {
  func.func @_apply_relu_kernel(%arg0: i32, %arg1: memref<12x16xf32, #tpu.memory_space<vmem>>, %arg2: memref<12x128xf32, #tpu.memory_space<vmem>>, %arg3: memref<12x1xf32, #tpu.memory_space<vmem>>, %arg4: memref<16x128xf32, #tpu.memory_space<vmem>>, %arg5: memref<128x128xf32, #tpu.memory_space<vmem>>, %arg6: memref<1x128xf32, #tpu.memory_space<vmem>>, %arg7: memref<12x128xf32, #tpu.memory_space<vmem>>) attributes {dimension_semantics = [#tpu.dimension_semantics<parallel>], iteration_bounds = array<i64: 1>, scalar_prefetch = 0 : i64, scratch_operands = 0 : i64, tpu.core_type = #tpu.core_type<tc>, window_params = [{transform_indices = @transform_0, window_bounds = array<i64: 12, 16>}, {transform_indices = @transform_1, window_bounds = array<i64: 12, 128>}, {transform_indices = @transform_2, window_bounds = array<i64: 12, 1>}, {pipeline_mode = #tpu.pipeline_mode<synchronous>, transform_indices = @transform_3, window_bounds = array<i64: 16, 128>}, {pipeline_mode = #tpu.pipeline_mode<synchronous>, transform_indices = @transform_4, window_bounds = array<i64: 128, 128>}, {pipeline_mode = #tpu.pipeline_mode<synchronous>, transform_indices = @transform_5, window_bounds = array<i64: 1, 128>}, {transform_indices = @transform_6, window_bounds = array<i64: 12, 128>}]} {
    %c0 = arith.constant 0 : index
    %c0_0 = arith.constant 0 : index
    %0 = vector.load %arg2[%c0, %c0_0] : memref<12x128xf32, #tpu.memory_space<vmem>>, vector<12x128xf32>
    %c0_1 = arith.constant 0 : index
    %c0_2 = arith.constant 0 : index
    %1 = vector.load %arg3[%c0_1, %c0_2] : memref<12x1xf32, #tpu.memory_space<vmem>>, vector<12x1xf32>
    %2 = vector.broadcast %1 : vector<12x1xf32> to vector<12x128xf32>
    %3 = arith.mulf %0, %2 : vector<12x128xf32>
    %c0_3 = arith.constant 0 : index
    %c0_4 = arith.constant 0 : index
    %4 = vector.load %arg1[%c0_3, %c0_4] : memref<12x16xf32, #tpu.memory_space<vmem>>, vector<12x16xf32>
    %c0_5 = arith.constant 0 : index
    %c0_6 = arith.constant 0 : index
    %5 = vector.load %arg4[%c0_5, %c0_6] : memref<16x128xf32, #tpu.memory_space<vmem>>, vector<16x128xf32>
    %cst = arith.constant dense<0.000000e+00> : vector<12x128xf32>
    %6 = tpu.matmul %4, %5, %cst {dimension_numbers = #tpu.dot_dimension_numbers<[1], [0], [0], [1], [0, 0, 1, 1], [], []>} : vector<12x16xf32>, vector<16x128xf32>, vector<12x128xf32> -> vector<12x128xf32>
    %c0_7 = arith.constant 0 : index
    %c0_8 = arith.constant 0 : index
    %7 = vector.load %arg5[%c0_7, %c0_8] : memref<128x128xf32, #tpu.memory_space<vmem>>, vector<128x128xf32>
    %cst_9 = arith.constant dense<0.000000e+00> : vector<12x128xf32>
    %8 = tpu.matmul %3, %7, %cst_9 {dimension_numbers = #tpu.dot_dimension_numbers<[1], [0], [0], [1], [0, 0, 1, 1], [], []>} : vector<12x128xf32>, vector<128x128xf32>, vector<12x128xf32> -> vector<12x128xf32>
    %9 = arith.addf %6, %8 : vector<12x128xf32>
    %c0_10 = arith.constant 0 : index
    %c0_11 = arith.constant 0 : index
    %10 = vector.load %arg6[%c0_10, %c0_11] : memref<1x128xf32, #tpu.memory_space<vmem>>, vector<1x128xf32>
    %11 = vector.broadcast %10 : vector<1x128xf32> to vector<12x128xf32>
    %12 = arith.addf %9, %11 : vector<12x128xf32>
    %cst_12 = arith.constant 0.000000e+00 : f32
    %13 = vector.broadcast %cst_12 : f32 to vector<12x128xf32>
    %14 = arith.maximumf %12, %13 : vector<12x128xf32>
    %c0_13 = arith.constant 0 : index
    %c0_14 = arith.constant 0 : index
    %15 = vector.load %arg7[%c0_13, %c0_14] : memref<12x128xf32, #tpu.memory_space<vmem>>, vector<12x128xf32>
    tpu.vector_store %arg7[%c0_13, %c0_14], %14 {strides = array<i32>} : memref<12x128xf32, #tpu.memory_space<vmem>>, vector<12x128xf32>,
    return
  }
  func.func @transform_0(%arg0: i32) -> (i32, i32) {
    %c0_i32 = arith.constant 0 : i32
    %c0_i32_0 = arith.constant 0 : i32
    return %arg0, %c0_i32 : i32, i32
  }
  func.func @transform_1(%arg0: i32) -> (i32, i32) {
    %c0_i32 = arith.constant 0 : i32
    %c0_i32_0 = arith.constant 0 : i32
    return %arg0, %c0_i32 : i32, i32
  }
  func.func @transform_2(%arg0: i32) -> (i32, i32) {
    %c0_i32 = arith.constant 0 : i32
    %c0_i32_0 = arith.constant 0 : i32
    return %arg0, %c0_i32 : i32, i32
  }
  func.func @transform_3(%arg0: i32) -> (i32, i32) {
    %c0_i32 = arith.constant 0 : i32
    %c0_i32_0 = arith.constant 0 : i32
    %c0_i32_1 = arith.constant 0 : i32
    return %c0_i32, %c0_i32_0 : i32, i32
  }
  func.func @transform_4(%arg0: i32) -> (i32, i32) {
    %c0_i32 = arith.constant 0 : i32
    %c0_i32_0 = arith.constant 0 : i32
    %c0_i32_1 = arith.constant 0 : i32
    return %c0_i32, %c0_i32_0 : i32, i32
  }
  func.func @transform_5(%arg0: i32) -> (i32, i32) {
    %c0_i32 = arith.constant 0 : i32
    %c0_i32_0 = arith.constant 0 : i32
    %c0_i32_1 = arith.constant 0 : i32
    return %c0_i32, %c0_i32_0 : i32, i32
  }
  func.func @transform_6(%arg0: i32) -> (i32, i32) {
    %c0_i32 = arith.constant 0 : i32
    %c0_i32_0 = arith.constant 0 : i32
    return %arg0, %c0_i32 : i32, i32
  }
}

module attributes {stable_mosaic.version = 11 : i64} {
  func.func @_sum_s_kernel(%arg0: i32, %arg1: memref<6x2x128xf32, #tpu.memory_space<vmem>>, %arg2: memref<6x128xf32, #tpu.memory_space<vmem>>) attributes {dimension_semantics = [#tpu.dimension_semantics<parallel>], iteration_bounds = array<i64: 1>, scalar_prefetch = 0 : i64, scratch_operands = 0 : i64, tpu.core_type = #tpu.core_type<tc>, window_params = [{transform_indices = @transform_0, window_bounds = array<i64: 6, 2, 128>}, {transform_indices = @transform_1, window_bounds = array<i64: 6, 128>}]} {
    %c0 = arith.constant 0 : index
    %c0_0 = arith.constant 0 : index
    %c0_1 = arith.constant 0 : index
    %0 = vector.load %arg1[%c0, %c0_0, %c0_1] : memref<6x2x128xf32, #tpu.memory_space<vmem>>, vector<6x2x128xf32>
    %cst = arith.constant dense<0.000000e+00> : vector<6x128xf32>
    %1 = vector.multi_reduction <add>, %0, %cst [1] : vector<6x2x128xf32> to vector<6x128xf32>
    %c0_2 = arith.constant 0 : index
    %c0_3 = arith.constant 0 : index
    %2 = vector.load %arg2[%c0_2, %c0_3] : memref<6x128xf32, #tpu.memory_space<vmem>>, vector<6x128xf32>
    tpu.vector_store %arg2[%c0_2, %c0_3], %1 {strides = array<i32>} : memref<6x128xf32, #tpu.memory_space<vmem>>, vector<6x128xf32>,
    return
  }
  func.func @transform_0(%arg0: i32) -> (i32, i32, i32) {
    %c0_i32 = arith.constant 0 : i32
    %c0_i32_0 = arith.constant 0 : i32
    %c0_i32_1 = arith.constant 0 : i32
    return %arg0, %c0_i32, %c0_i32_0 : i32, i32, i32
  }
  func.func @transform_1(%arg0: i32) -> (i32, i32) {
    %c0_i32 = arith.constant 0 : i32
    %c0_i32_0 = arith.constant 0 : i32
    return %arg0, %c0_i32 : i32, i32
  }
}

module attributes {stable_mosaic.version = 11 : i64} {
  func.func @_apply_relu_kernel(%arg0: i32, %arg1: memref<12x128xf32, #tpu.memory_space<vmem>>, %arg2: memref<12x128xf32, #tpu.memory_space<vmem>>, %arg3: memref<12x1xf32, #tpu.memory_space<vmem>>, %arg4: memref<128x128xf32, #tpu.memory_space<vmem>>, %arg5: memref<128x128xf32, #tpu.memory_space<vmem>>, %arg6: memref<1x128xf32, #tpu.memory_space<vmem>>, %arg7: memref<12x128xf32, #tpu.memory_space<vmem>>) attributes {dimension_semantics = [#tpu.dimension_semantics<parallel>], iteration_bounds = array<i64: 1>, scalar_prefetch = 0 : i64, scratch_operands = 0 : i64, tpu.core_type = #tpu.core_type<tc>, window_params = [{transform_indices = @transform_0, window_bounds = array<i64: 12, 128>}, {transform_indices = @transform_1, window_bounds = array<i64: 12, 128>}, {transform_indices = @transform_2, window_bounds = array<i64: 12, 1>}, {pipeline_mode = #tpu.pipeline_mode<synchronous>, transform_indices = @transform_3, window_bounds = array<i64: 128, 128>}, {pipeline_mode = #tpu.pipeline_mode<synchronous>, transform_indices = @transform_4, window_bounds = array<i64: 128, 128>}, {pipeline_mode = #tpu.pipeline_mode<synchronous>, transform_indices = @transform_5, window_bounds = array<i64: 1, 128>}, {transform_indices = @transform_6, window_bounds = array<i64: 12, 128>}]} {
    %c0 = arith.constant 0 : index
    %c0_0 = arith.constant 0 : index
    %0 = vector.load %arg2[%c0, %c0_0] : memref<12x128xf32, #tpu.memory_space<vmem>>, vector<12x128xf32>
    %c0_1 = arith.constant 0 : index
    %c0_2 = arith.constant 0 : index
    %1 = vector.load %arg3[%c0_1, %c0_2] : memref<12x1xf32, #tpu.memory_space<vmem>>, vector<12x1xf32>
    %2 = vector.broadcast %1 : vector<12x1xf32> to vector<12x128xf32>
    %3 = arith.mulf %0, %2 : vector<12x128xf32>
    %c0_3 = arith.constant 0 : index
    %c0_4 = arith.constant 0 : index
    %4 = vector.load %arg1[%c0_3, %c0_4] : memref<12x128xf32, #tpu.memory_space<vmem>>, vector<12x128xf32>
    %c0_5 = arith.constant 0 : index
    %c0_6 = arith.constant 0 : index
    %5 = vector.load %arg4[%c0_5, %c0_6] : memref<128x128xf32, #tpu.memory_space<vmem>>, vector<128x128xf32>
    %cst = arith.constant dense<0.000000e+00> : vector<12x128xf32>
    %6 = tpu.matmul %4, %5, %cst {dimension_numbers = #tpu.dot_dimension_numbers<[1], [0], [0], [1], [0, 0, 1, 1], [], []>} : vector<12x128xf32>, vector<128x128xf32>, vector<12x128xf32> -> vector<12x128xf32>
    %c0_7 = arith.constant 0 : index
    %c0_8 = arith.constant 0 : index
    %7 = vector.load %arg5[%c0_7, %c0_8] : memref<128x128xf32, #tpu.memory_space<vmem>>, vector<128x128xf32>
    %cst_9 = arith.constant dense<0.000000e+00> : vector<12x128xf32>
    %8 = tpu.matmul %3, %7, %cst_9 {dimension_numbers = #tpu.dot_dimension_numbers<[1], [0], [0], [1], [0, 0, 1, 1], [], []>} : vector<12x128xf32>, vector<128x128xf32>, vector<12x128xf32> -> vector<12x128xf32>
    %9 = arith.addf %6, %8 : vector<12x128xf32>
    %c0_10 = arith.constant 0 : index
    %c0_11 = arith.constant 0 : index
    %10 = vector.load %arg6[%c0_10, %c0_11] : memref<1x128xf32, #tpu.memory_space<vmem>>, vector<1x128xf32>
    %11 = vector.broadcast %10 : vector<1x128xf32> to vector<12x128xf32>
    %12 = arith.addf %9, %11 : vector<12x128xf32>
    %cst_12 = arith.constant 0.000000e+00 : f32
    %13 = vector.broadcast %cst_12 : f32 to vector<12x128xf32>
    %14 = arith.maximumf %12, %13 : vector<12x128xf32>
    %c0_13 = arith.constant 0 : index
    %c0_14 = arith.constant 0 : index
    %15 = vector.load %arg7[%c0_13, %c0_14] : memref<12x128xf32, #tpu.memory_space<vmem>>, vector<12x128xf32>
    tpu.vector_store %arg7[%c0_13, %c0_14], %14 {strides = array<i32>} : memref<12x128xf32, #tpu.memory_space<vmem>>, vector<12x128xf32>,
    return
  }
  func.func @transform_0(%arg0: i32) -> (i32, i32) {
    %c0_i32 = arith.constant 0 : i32
    %c0_i32_0 = arith.constant 0 : i32
    return %arg0, %c0_i32 : i32, i32
  }
  func.func @transform_1(%arg0: i32) -> (i32, i32) {
    %c0_i32 = arith.constant 0 : i32
    %c0_i32_0 = arith.constant 0 : i32
    return %arg0, %c0_i32 : i32, i32
  }
  func.func @transform_2(%arg0: i32) -> (i32, i32) {
    %c0_i32 = arith.constant 0 : i32
    %c0_i32_0 = arith.constant 0 : i32
    return %arg0, %c0_i32 : i32, i32
  }
  func.func @transform_3(%arg0: i32) -> (i32, i32) {
    %c0_i32 = arith.constant 0 : i32
    %c0_i32_0 = arith.constant 0 : i32
    %c0_i32_1 = arith.constant 0 : i32
    return %c0_i32, %c0_i32_0 : i32, i32
  }
  func.func @transform_4(%arg0: i32) -> (i32, i32) {
    %c0_i32 = arith.constant 0 : i32
    %c0_i32_0 = arith.constant 0 : i32
    %c0_i32_1 = arith.constant 0 : i32
    return %c0_i32, %c0_i32_0 : i32, i32
  }
  func.func @transform_5(%arg0: i32) -> (i32, i32) {
    %c0_i32 = arith.constant 0 : i32
    %c0_i32_0 = arith.constant 0 : i32
    %c0_i32_1 = arith.constant 0 : i32
    return %c0_i32, %c0_i32_0 : i32, i32
  }
  func.func @transform_6(%arg0: i32) -> (i32, i32) {
    %c0_i32 = arith.constant 0 : i32
    %c0_i32_0 = arith.constant 0 : i32
    return %arg0, %c0_i32 : i32, i32
  }
}

</mosaic_0001>

<bundles_post_ra>
// kernel: run.9
= control target key start
LH: loop header
LB: loop body
LE: loop exit
PB: predicated region body
PF: predicated region fallthrough
CT: control target
= control target key end

     0   :  { %vm25_vm0 = vcmask 130048   ;;  %s172_s1 = inlined_call_operand.vmem [shape: f32[16,128], index: 1, kind: input, shape index: {}]   ;;  %s173_s0 = inlined_call_operand.vmem [shape: f32[12,16], index: 0, kind: input, shape index: {}]   ;;  %s174_s2 = inlined_call_operand.vmem [shape: f32[1,128], index: 2, kind: input, shape index: {}]   ;;  %s175_s3 = inlined_call_operand.vmem [shape: f32[12,128], index: 3, kind: output, shape index: {}]  }
   0x1   :  { %v16_v0 = vld [vmem:[%s172_s1] sm:$0xff]  ;;  %v17_v1 = vld [vmem:[%s172_s1 + $0x8] sm:$0xff] }
   0x2   :  { %v14_v2 = vld [vmem:[%s173_s0] sm:$0xff]  ;;  %v127_v3 = vpack.c.bf16 %v17_v1, %v16_v0  ;;  %v15_v4 = vld [vmem:[%s173_s0 + $0x8] sm:$0xf] }
   0x3   :  { %124 = vmatprep.mubr.msk.f32.mxu0 %vm25_vm0, %v14_v2  ;;  %v113_v5 = vld [vmem:[%s174_s2] ss:$0 sm:$0xff] }
   0x4   :  { %128 = vmatprep.subr.bf16.mxu0 %v127_v3 }
   0x5   :  { %130 = vmatpush3.bf16.msra.mxu0 %v127_v3 }
   0x8   :  { %125 = vmatmul.mubr.msk.f32.vlgmr.msra.gmra.mrb[0].mxu0 %vm25_vm0, %v15_v4 }
  0xdb   :  { %v126_v6 = vpop.f32.mrb[0].mxu0 }
  0xdc   :  { %v104_v7 = vadd.f32 %v126_v6, %v113_v5  ;;  %v98_v8 = vpop.f32.mrb[1].mxu0 }
  0xdd   :  { %v99_v9 = vadd.f32 %v113_v5, %v98_v8 }
  0xde   :  { %108 = vst [vmem:[%s175_s3 + $0x8] sm:$0xf] %v104_v7 }
  0xdf   :  { %107 = vst [vmem:[%s175_s3] sm:$0xff] %v99_v9 }

// kernel: run.11
= control target key start
LH: loop header
LB: loop body
LE: loop exit
PB: predicated region body
PF: predicated region fallthrough
CT: control target
= control target key end

     0   :  { %s166_s0 = inlined_call_operand.vmem [shape: s32[12], index: 0, kind: input, shape index: {}]   ;;  %s167_s2 = inlined_call_operand.vmem [shape: f32[12,128], index: 2, kind: input, shape index: {}]   ;;  %s168_s3 = inlined_call_operand.vmem [shape: f32[24,128], index: 3, kind: input, shape index: {}]   ;;  %s169_s4 = inlined_call_operand.vmem [shape: f32[12,128], index: 4, kind: output, shape index: {}]   ;;  %s170_s1 = inlined_call_operand.vmem [shape: s32[12], index: 1, kind: input, shape index: {}]  }
   0x1   :  { %s9_s17 = sshll.u32 %s166_s0, 4  ;;  %s13_s20 = sshll.u32 %s170_s1, 4  ;;  %s10_s17 = int_to_ptr.vmem [resolvable:$true] %s9_s17  ;;  %s14_s20 = int_to_ptr.vmem [resolvable:$true] %s13_s20 }
   0x2   :  { %s83_s21 = scalar_lea.vmem %s10_s17, 16  ;;  %p88_p1 = scmp.lt.s32.totalorder %s10_s17, %s10_s17 }
   0x3   :  { %p84_p0 = scmp.ne.s32.totalorder %s10_s17, %s83_s21  ;;  %p89_p2 = scmp.lt.s32.totalorder %s83_s21, %s83_s21 }
   0x5   :  { %p90_p3 = por %p89_p2, %p88_p1 }
   0x7   :  { %p91_p4 = pnand %p90_p3, %p84_p0 }
   0x9   :  { %94 = shalt.err (!%p91_p4)  }
   0xa   :  { %s117_s22 = smov [#allocation3]   ;;  %s95_s23 = scalar_lea.vmem %s14_s20, 16 }
   0xb   :  { %12 = dma.vmem_to_smem %s10_s17, 16, %s117_s22, [#allocation2] }
   0xc   :  { %p96_p5 = scmp.ne.s32.totalorder %s14_s20, %s95_s23  ;;  %p100_p6 = scmp.lt.s32.totalorder %s14_s20, %s14_s20 }
   0xd   :  { %p101_p7 = scmp.lt.s32.totalorder %s95_s23, %s95_s23 }
   0xf   :  { %p102_p8 = por %p101_p7, %p100_p6 }
  0x11   :  { %p103_p9 = pnand %p102_p8, %p96_p5 }
  0x13   :  { %106 = shalt.err (!%p103_p9)  }
  0x14   :  { %s118_s0 = smov [#allocation4]  }
  0x15   :  { %16 = dma.vmem_to_smem %s14_s20, 16, %s118_s0, [#allocation2] }
  0x16   :  { %111 = dma.done.wait [#allocation2], 32 }
  0x17   :  { %112 = vsyncadd [#allocation2], 4294967264 }
  0x18   :  { %18 = sfence }
  0x19   :  { %v119_v0 = vmov 0.0   ;;  %s113_s27 = smov 0  }
  0x1a   :  { %27 = vst [vmem:[%s169_s4] sm:$0xff] %v119_v0  ;;  %28 = vst [vmem:[%s169_s4 + $0x8] sm:$0xf] %v119_v0 }
  0x1b LB: > { %s40_s28 = sld [smem:[#allocation3 + %s115_s27]]  ;;  %s71_s30 = sshll.u32 %s115_s27, 1  ;;  %s115_s27 = sphi %s113_s27, %s36_s27  }
  0x1c   : > { %s42_s29 = sld [smem:[#allocation4 + %s115_s27]]  ;;  %s47_s7 = scalar_lea.vmem %s168_s3, %s71_s30 }
  0x1d   : > { %v48_v1 = vld [vmem:[%s47_s7] sm:$0x3]  ;;  %s36_s27 = sadd.s32 1, %s115_s27  }
  0x1e   : > { %p35_p10 = scmp.ge.s32.totalorder %s36_s27, 12 }
  0x21   : > { %s69_s8 = sshll.u32 %s40_s28, 1 }
  0x22   : > { %s70_s9 = sshll.u32 %s42_s29, 1  ;;  %s44_s12 = scalar_lea.vmem %s167_s2, %s69_s8 }
  0x23   : > { %s50_s15 = scalar_lea.vmem %s169_s4, %s70_s9  ;;  %v45_v2 = vld [vmem:[%s44_s12] sm:$0x3]  ;;  %38 = sbr.rel (!%p35_p10) target bundleno = 27 (0x1b), region = 42 }
  0x24   : > { %v51_v3 = vld [vmem:[%s50_s15] sm:$0x3]  ;;  %v49_v4 = vadd.f32 %v48_v1, %v45_v2 }
  0x26   : > { %v52_v5 = vadd.f32 %v51_v3, %v49_v4 }
  0x28   : > { %53 = vst [vmem:[%s50_s15] sm:$0x3] %v52_v5 }

// kernel: run.10
= control target key start
LH: loop header
LB: loop body
LE: loop exit
PB: predicated region body
PF: predicated region fallthrough
CT: control target
= control target key end

     0   :  { %vm25_vm0 = vcmask 64512   ;;  %v145_v0 = vmov 0.0   ;;  %vm146_vm1 = vmmov 0   ;;  %s194_s1 = inlined_call_operand.vmem [shape: f32[8,128], index: 1, kind: input, shape index: {}]   ;;  %s195_s0 = inlined_call_operand.vmem [shape: f32[24,8], index: 0, kind: input, shape index: {}]   ;;  %s196_s2 = inlined_call_operand.vmem [shape: f32[1,128], index: 2, kind: input, shape index: {}]   ;;  %s197_s3 = inlined_call_operand.vmem [shape: f32[24,128], index: 3, kind: output, shape index: {}]  }
   0x1   :  { %141 = vmatprep.subr.mxu1 %v145_v0  ;;  %v17_v1 = vld [vmem:[%s194_s1] sm:$0xff]  ;;  %135 = vmatprep.mubr.msk.f32.mxu1 %vm146_vm1, %v145_v0  ;;  %v15_v2 = vld [vmem:[%s195_s0 + $0x8] sm:$0xff]  ;;  %v16_v4 = vld [vmem:[%s195_s0 + $0x10] sm:$0xff] }
   0x2   :  { %142 = vmatpush3.msra.mxu1 %v17_v1  ;;  %130 = vmatprep.subr.mxu0 %v145_v0  ;;  %v14_v3 = vld [vmem:[%s195_s0] sm:$0xff] }
   0x3   :  { %136 = vmatmul.mubr.msk.f32.vlgmr.msra.gmra.mrb[0].mxu1 %vm25_vm0, %v15_v2  ;;  %131 = vmatpush3.msra.mxu0 %v17_v1  ;;  %v122_v5 = vld [vmem:[%s196_s2] ss:$0 sm:$0xff] }
   0x4   :  { %132 = vmatprep.mubr.msk.f32.mxu0 %vm146_vm1, %v145_v0  ;;  %138 = vmatprep.mubr.msk.f32.mxu1 %vm146_vm1, %v145_v0 }
   0x5   :  { %133 = vmatmul.mubr.msk.f32.vlgmr.msra.gmra.mrb[0].mxu0 %vm25_vm0, %v14_v3 }
   0x7   :  { %139 = vmatmul.mubr.msk.f32.gmra.mrb[2].mxu1 %vm25_vm0, %v16_v4 }
  0xd6   :  { %v106_v6 = vpop.f32.mrb[0].mxu1 }
  0xd7   :  { %v107_v7 = vadd.f32 %v122_v5, %v106_v6  ;;  %v137_v8 = vpop.f32.mrb[1].mxu1 }
  0xd8   :  { %v101_v9 = vpop.f32.mrb[0].mxu0 }
  0xd9   :  { %116 = vst [vmem:[%s197_s3 + $0x8] sm:$0xff] %v107_v7  ;;  %v102_v10 = vadd.f32 %v122_v5, %v101_v9  ;;  %v134_v11 = vpop.f32.mrb[1].mxu0 }
  0xda   :  { %v111_v12 = vpop.f32.mrb[2].mxu1 }
  0xdb   :  { %115 = vst [vmem:[%s197_s3] sm:$0xff] %v102_v10  ;;  %v112_v13 = vadd.f32 %v122_v5, %v111_v12  ;;  %v140_v14 = vpop.f32.mrb[3].mxu1 }
  0xdd   :  { %117 = vst [vmem:[%s197_s3 + $0x10] sm:$0xff] %v112_v13 }

// kernel: run.13
= control target key start
LH: loop header
LB: loop body
LE: loop exit
PB: predicated region body
PF: predicated region fallthrough
CT: control target
= control target key end

     0   :  { %s289_s1 = inlined_call_operand.vmem [shape: f32[128,128], index: 1, kind: input, shape index: {}]   ;;  %s290_s0 = inlined_call_operand.vmem [shape: f32[12,128], index: 0, kind: input, shape index: {}]   ;;  %s291_s2 = inlined_call_operand.vmem [shape: f32[1,128], index: 2, kind: input, shape index: {}]   ;;  %s292_s3 = inlined_call_operand.vmem [shape: f32[12,128], index: 3, kind: output, shape index: {}]  }
   0x1   :  { %v16_v0 = vld [vmem:[%s289_s1] sm:$0xff]  ;;  %v17_v1 = vld [vmem:[%s289_s1 + $0x8] sm:$0xff]  ;;  %v18_v2 = vld [vmem:[%s289_s1 + $0x10] sm:$0xff] }
   0x2   :  { %v174_v3 = vpack.c.bf16 %v17_v1, %v16_v0  ;;  %v19_v4 = vld [vmem:[%s289_s1 + $0x18] sm:$0xff]  ;;  %v20_v6 = vld [vmem:[%s289_s1 + $0x20] sm:$0xff]  ;;  %v21_v7 = vld [vmem:[%s289_s1 + $0x28] sm:$0xff] }
   0x3   :  { %v178_v5 = vpack.c.bf16 %v19_v4, %v18_v2  ;;  %v182_v8 = vpack.c.bf16 %v21_v7, %v20_v6  ;;  %v14_v9 = vld [vmem:[%s290_s0] sm:$0xff]  ;;  %v22_v10 = vld [vmem:[%s289_s1 + $0x30] sm:$0xff]  ;;  %v23_v11 = vld [vmem:[%s289_s1 + $0x38] sm:$0xff] }
   0x4   :  { %175 = vmatprep.subr.bf16.mxu0 %v174_v3  ;;  %171 = vmatprep.mubr.f32.mxu0 %v14_v9  ;;  %v186_v12 = vpack.c.bf16 %v23_v11, %v22_v10  ;;  %v24_v13 = vld [vmem:[%s289_s1 + $0x40] sm:$0xff]  ;;  %v25_v14 = vld [vmem:[%s289_s1 + $0x48] sm:$0xff]  ;;  %v26_v16 = vld [vmem:[%s289_s1 + $0x50] sm:$0xff] }
   0x5   :  { %177 = vmatpush3.bf16.msra.mxu0 %v174_v3  ;;  %v190_v15 = vpack.c.bf16 %v25_v14, %v24_v13  ;;  %v27_v17 = vld [vmem:[%s289_s1 + $0x58] sm:$0xff]  ;;  %v28_v19 = vld [vmem:[%s289_s1 + $0x60] sm:$0xff]  ;;  %v29_v20 = vld [vmem:[%s289_s1 + $0x68] sm:$0xff] }
   0x6   :  { %179 = vmatprep.subr.bf16.mxu0 %v178_v5  ;;  %v194_v18 = vpack.c.bf16 %v27_v17, %v26_v16  ;;  %v198_v21 = vpack.c.bf16 %v29_v20, %v28_v19  ;;  %v30_v22 = vld [vmem:[%s289_s1 + $0x70] sm:$0xff]  ;;  %v31_v23 = vld [vmem:[%s289_s1 + $0x78] sm:$0xff]  ;;  %v15_v25 = vld [vmem:[%s290_s0 + $0x8] sm:$0xf] }
   0x7   :  { %v202_v24 = vpack.c.bf16 %v31_v23, %v30_v22  ;;  %v120_v26 = vld [vmem:[%s291_s2] ss:$0 sm:$0xff] }
   0x9   :  { %181 = vmatpush3.bf16.msra.mxu0 %v178_v5 }
   0xa   :  { %183 = vmatprep.subr.bf16.mxu0 %v182_v8 }
   0xd   :  { %185 = vmatpush3.bf16.msra.mxu0 %v182_v8 }
   0xe   :  { %187 = vmatprep.subr.bf16.mxu0 %v186_v12 }
  0x11   :  { %189 = vmatpush3.bf16.msra.mxu0 %v186_v12 }
  0x12   :  { %191 = vmatprep.subr.bf16.mxu0 %v190_v15 }
  0x15   :  { %193 = vmatpush3.bf16.msra.mxu0 %v190_v15 }
  0x16   :  { %195 = vmatprep.subr.bf16.mxu0 %v194_v18 }
  0x19   :  { %197 = vmatpush3.bf16.msra.mxu0 %v194_v18 }
  0x1a   :  { %199 = vmatprep.subr.bf16.mxu0 %v198_v21 }
  0x1d   :  { %201 = vmatpush3.bf16.msra.mxu0 %v198_v21 }
  0x1e   :  { %203 = vmatprep.subr.bf16.mxu0 %v202_v24 }
  0x21   :  { %205 = vmatpush3.bf16.msra.mxu0 %v202_v24 }
  0x24   :  { %172 = vmatmul.mubr.f32.vlgmr.msra.gmra.mrb[0].mxu0 %v15_v25 }
  0xf7   :  { %v173_v27 = vpop.f32.mrb[0].mxu0 }
  0xf8   :  { %v111_v28 = vadd.f32 %v173_v27, %v120_v26  ;;  %v105_v29 = vpop.f32.mrb[1].mxu0 }
  0xf9   :  { %v106_v30 = vadd.f32 %v120_v26, %v105_v29 }
  0xfa   :  { %115 = vst [vmem:[%s292_s3 + $0x8] sm:$0xf] %v111_v28 }
  0xfb   :  { %114 = vst [vmem:[%s292_s3] sm:$0xff] %v106_v30 }

// kernel: run.12
= control target key start
LH: loop header
LB: loop body
LE: loop exit
PB: predicated region body
PF: predicated region fallthrough
CT: control target
= control target key end

     0   :  { %v340_v0 = vmov 0   ;;  %vm134_vm0 = vcmask 130048   ;;  %s459_s2 = inlined_call_operand.vmem [shape: f32[12,1], index: 2, kind: input, shape index: {}]   ;;  %s460_s4 = inlined_call_operand.vmem [shape: f32[128,128], index: 4, kind: input, shape index: {}]   ;;  %s461_s3 = inlined_call_operand.vmem [shape: f32[16,128], index: 3, kind: input, shape index: {}]   ;;  %s462_s0 = inlined_call_operand.vmem [shape: f32[12,16], index: 0, kind: input, shape index: {}]   ;;  %s463_s1 = inlined_call_operand.vmem [shape: f32[12,128], index: 1, kind: input, shape index: {}]   ;;  %s464_s5 = inlined_call_operand.vmem [shape: f32[1,128], index: 5, kind: input, shape index: {}]   ;;  %s465_s6 = inlined_call_operand.vmem [shape: f32[12,128], index: 6, kind: output, shape index: {}]  }
   0x1   :  { %339 = vset.pattern.permute.xlu0 %v340_v0  ;;  %v25_v1 = vld [vmem:[%s459_s2] sm:$0xff]  ;;  %v44_v3 = vld [vmem:[%s460_s4 + $0x8] sm:$0xff]  ;;  %v45_v4 = vld [vmem:[%s460_s4 + $0x10] sm:$0xff] }
   0x2   :  { %v43_v2 = vld [vmem:[%s460_s4] sm:$0xff]  ;;  %29 = vperm.xlu0 %339, %v25_v1   ;;  %v46_v5 = vld [vmem:[%s460_s4 + $0x18] sm:$0xff]  ;;  %v26_v6 = vld [vmem:[%s459_s2 + $0x8] sm:$0xf] }
   0x3   :  { %v300_v7 = vpack.c.bf16 %v44_v3, %v43_v2  ;;  %v304_v8 = vpack.c.bf16 %v46_v5, %v45_v4  ;;  %v47_v9 = vld [vmem:[%s460_s4 + $0x20] sm:$0xff]  ;;  %v48_v10 = vld [vmem:[%s460_s4 + $0x28] sm:$0xff]  ;;  %v49_v15 = vld [vmem:[%s460_s4 + $0x30] sm:$0xff] }
   0x4   :  { %v41_v11 = vld [vmem:[%s461_s3] sm:$0xff]  ;;  %v42_v12 = vld [vmem:[%s461_s3 + $0x8] sm:$0xff]  ;;  %v308_v13 = vpack.c.bf16 %v48_v10, %v47_v9  ;;  %v50_v16 = vld [vmem:[%s460_s4 + $0x38] sm:$0xff] }
   0x5   :  { %301 = vmatprep.subr.bf16.mxu1 %v300_v7  ;;  %v332_v14 = vpack.c.bf16 %v42_v12, %v41_v11  ;;  %v39_v17 = vld [vmem:[%s462_s0] sm:$0xff]  ;;  %v40_v18 = vld [vmem:[%s462_s0 + $0x8] sm:$0xf]  ;;  %v312_v19 = vpack.c.bf16 %v50_v16, %v49_v15  ;;  %v53_v23 = vld [vmem:[%s460_s4 + $0x50] sm:$0xff] }
   0x6   :  { %34 = vperm.xlu0 %339, %v26_v6   ;;  %303 = vmatpush3.bf16.msra.mxu1 %v300_v7  ;;  %v51_v20 = vld [vmem:[%s460_s4 + $0x40] sm:$0xff]  ;;  %v52_v21 = vld [vmem:[%s460_s4 + $0x48] sm:$0xff]  ;;  %v54_v24 = vld [vmem:[%s460_s4 + $0x58] sm:$0xff] }
   0x7   :  { %305 = vmatprep.subr.bf16.mxu1 %v304_v8  ;;  %333 = vmatprep.subr.bf16.mxu0 %v332_v14  ;;  %v316_v22 = vpack.c.bf16 %v52_v21, %v51_v20  ;;  %v320_v25 = vpack.c.bf16 %v54_v24, %v53_v23  ;;  %v55_v26 = vld [vmem:[%s460_s4 + $0x60] sm:$0xff]  ;;  %v56_v27 = vld [vmem:[%s460_s4 + $0x68] sm:$0xff]  ;;  %v57_v29 = vld [vmem:[%s460_s4 + $0x70] sm:$0xff] }
   0x8   :  { %297 = vmatprep.mubr.msk.f32.mxu0 %vm134_vm0, %v39_v17  ;;  %335 = vmatpush3.bf16.msra.mxu0 %v332_v14  ;;  %v324_v28 = vpack.c.bf16 %v56_v27, %v55_v26  ;;  %v58_v30 = vld [vmem:[%s460_s4 + $0x78] sm:$0xff]  ;;  %v23_v32 = vld [vmem:[%s463_s1] sm:$0xff]  ;;  %v24_v35 = vld [vmem:[%s463_s1 + $0x8] sm:$0xf] }
   0x9   :  { %v328_v31 = vpack.c.bf16 %v58_v30, %v57_v29  ;;  %v235_v41 = vld [vmem:[%s464_s5] ss:$0 sm:$0xff] }
   0xa   :  { %307 = vmatpush3.bf16.msra.mxu1 %v304_v8 }
   0xb   :  { %309 = vmatprep.subr.bf16.mxu1 %v308_v13  ;;  %298 = vmatmul.mubr.msk.f32.vlgmr.msra.gmra.mrb[0].mxu0 %vm134_vm0, %v40_v18 }
   0xe   :  { %311 = vmatpush3.bf16.msra.mxu1 %v308_v13 }
   0xf   :  { %313 = vmatprep.subr.bf16.mxu1 %v312_v19 }
  0x12   :  { %315 = vmatpush3.bf16.msra.mxu1 %v312_v19 }
  0x13   :  { %317 = vmatprep.subr.bf16.mxu1 %v316_v22 }
  0x16   :  { %319 = vmatpush3.bf16.msra.mxu1 %v316_v22 }
  0x17   :  { %321 = vmatprep.subr.bf16.mxu1 %v320_v25 }
  0x1a   :  { %323 = vmatpush3.bf16.msra.mxu1 %v320_v25 }
  0x1b   :  { %325 = vmatprep.subr.bf16.mxu1 %v324_v28 }
  0x1e   :  { %327 = vmatpush3.bf16.msra.mxu1 %v324_v28 }
  0x1f   :  { %329 = vmatprep.subr.bf16.mxu1 %v328_v31 }
  0x22   :  { %331 = vmatpush3.bf16.msra.mxu1 %v328_v31 }
  0x81   :  { %v30_v33 = vpop.permute.xlu0 %29 }
  0x82   :  { %v37_v34 = vmul.f32 %v30_v33, %v23_v32 }
  0x84   :  { %290 = vmatprep.mubr.f32.mxu1 %v37_v34 }
  0x85   :  { %v35_v36 = vpop.permute.xlu0 %34 }
  0x86   :  { %v38_v37 = vmul.f32 %v35_v36, %v24_v35 }
  0x88   :  { %291 = vmatmul.mubr.f32.vlgmr.msra.gmra.mrb[0].mxu1 %v38_v37 }
  0xde   :  { %v299_v38 = vpop.f32.mrb[0].mxu0 }
  0xdf   :  { %v207_v39 = vpop.f32.mrb[1].mxu0 }
 0x15b   :  { %v292_v40 = vpop.f32.mrb[0].mxu1 }
 0x15c   :  { %v213_v42 = vadd.f32 %v299_v38, %v292_v40  ;;  %v125_v43 = vpop.f32.mrb[1].mxu1 }
 0x15d   :  { %v208_v44 = vadd.f32 %v207_v39, %v125_v43 }
 0x15e   :  { %v224_v45 = vadd.f32 %v235_v41, %v213_v42 }
 0x15f   :  { %v223_v46 = vadd.f32 %v235_v41, %v208_v44 }
 0x160   :  { %v226_v47 = vmax.f32 %v224_v45, 0.0 }
 0x161   :  { %v225_v48 = vmax.f32 %v223_v46, 0.0 }
 0x162   :  { %228 = vst [vmem:[%s465_s6 + $0x8] sm:$0xf] %v226_v47 }
 0x163   :  { %227 = vst [vmem:[%s465_s6] sm:$0xff] %v225_v48 }

// kernel: run.17
= control target key start
LH: loop header
LB: loop body
LE: loop exit
PB: predicated region body
PF: predicated region fallthrough
CT: control target
= control target key end

     0   :  { %vm15_vm0 = vcmask 1041408   ;;  %s156_s0 = inlined_call_operand.vmem [shape: f32[6,2,128], index: 0, kind: input, shape index: {}]   ;;  %s157_s1 = inlined_call_operand.hbm [shape: f32[6,128], index: 1, kind: output, shape index: {}]  }
   0x1   :  { %v9_v0 = vld [vmem:[%s156_s0] sm:$0x3]  ;;  %v10_v1 = vld [vmem:[%s156_s0 + $0x2] sm:$0x3]  ;;  %v11_v2 = vld [vmem:[%s156_s0 + $0x4] sm:$0x3] }
   0x2   :  { %v12_v3 = vld [vmem:[%s156_s0 + $0x6] sm:$0x3]  ;;  %v13_v4 = vld [vmem:[%s156_s0 + $0x8] sm:$0x3]  ;;  %v14_v5 = vld [vmem:[%s156_s0 + $0xa] sm:$0x3] }
   0x3   :  { %6 = vsyncpa [#allocation3], 0  ;;  %v16_v6 = vsel %vm15_vm0, %v9_v0, 0.0  ;;  %v23_v7 = vsel %vm15_vm0, %v10_v1, 0.0  ;;  %v30_v8 = vsel %vm15_vm0, %v11_v2, 0.0  ;;  %v37_v9 = vsel %vm15_vm0, %v12_v3, 0.0 }
   0x4   :  { %v17_v10 = vrot.slane %v16_v6, 4  ;;  %v24_v11 = vrot.slane %v23_v7, 4  ;;  %v31_v12 = vrot.slane %v30_v8, 4  ;;  %v38_v13 = vrot.slane %v37_v9, 4  ;;  %s115_s0 = smov [#allocation2]  }
   0x5   :  { %v44_v14 = vsel %vm15_vm0, %v13_v4, 0.0  ;;  %v51_v15 = vsel %vm15_vm0, %v14_v5, 0.0  ;;  %vm64_vm1 = vcmask 1041409   ;;  %vm66_vm2 = vcmask 1042434   ;;  %s82_s18 = sshll.u32 %s115_s0, 4  ;;  %s83_s18 = int_to_ptr.vmem [resolvable:$true] %s82_s18 }
   0x6   :  { %v18_v16 = vadd.f32 %v17_v10, %v16_v6  ;;  %v25_v17 = vadd.f32 %v24_v11, %v23_v7  ;;  %v32_v18 = vadd.f32 %v31_v12, %v30_v8  ;;  %v39_v19 = vadd.f32 %v38_v13, %v37_v9  ;;  %s91_s19 = scalar_lea.vmem %s83_s18, 128  ;;  %p96_p1 = scmp.lt.s32.totalorder %s83_s18, %s83_s18 }
   0x7   :  { %v45_v20 = vrot.slane %v44_v14, 4  ;;  %v52_v21 = vrot.slane %v51_v15, 4  ;;  %vm68_vm3 = vcmask 1043459   ;;  %vm70_vm4 = vcmask 1044484   ;;  %p92_p0 = scmp.ne.s32.totalorder %s83_s18, %s91_s19  ;;  %p97_p2 = scmp.lt.s32.totalorder %s91_s19, %s91_s19 }
   0x8   :  { %v19_v22 = vrot.slane %v18_v16, 2  ;;  %v26_v23 = vrot.slane %v25_v17, 2  ;;  %v33_v24 = vrot.slane %v32_v18, 2  ;;  %v40_v25 = vrot.slane %v39_v19, 2 }
   0x9   :  { %v46_v26 = vadd.f32 %v45_v20, %v44_v14  ;;  %v53_v27 = vadd.f32 %v52_v21, %v51_v15  ;;  %vm72_vm5 = vcmask 1045509   ;;  %p98_p3 = por %p97_p2, %p96_p1 }
   0xa   :  { %v20_v28 = vadd.f32 %v19_v22, %v18_v16  ;;  %v27_v29 = vadd.f32 %v26_v23, %v25_v17  ;;  %v34_v30 = vadd.f32 %v33_v24, %v32_v18  ;;  %v41_v31 = vadd.f32 %v40_v25, %v39_v19 }
   0xb   :  { %v47_v32 = vrot.slane %v46_v26, 2  ;;  %v54_v33 = vrot.slane %v53_v27, 2  ;;  %p99_p4 = pnand %p98_p3, %p92_p0 }
   0xc   :  { %v21_v34 = vrot.slane %v20_v28, 1  ;;  %v28_v35 = vrot.slane %v27_v29, 1  ;;  %v35_v36 = vrot.slane %v34_v30, 1  ;;  %v42_v37 = vrot.slane %v41_v31, 1 }
   0xd   :  { %v48_v38 = vadd.f32 %v47_v32, %v46_v26  ;;  %v55_v39 = vadd.f32 %v54_v33, %v53_v27 }
   0xe   :  { %v22_v40 = vadd.f32 %v21_v34, %v20_v28  ;;  %v29_v41 = vadd.f32 %v28_v35, %v27_v29  ;;  %v36_v42 = vadd.f32 %v35_v36, %v34_v30  ;;  %v43_v43 = vadd.f32 %v42_v37, %v41_v31 }
   0xf   :  { %v49_v44 = vrot.slane %v48_v38, 1  ;;  %v56_v45 = vrot.slane %v55_v39, 1 }
  0x10   :  { %v65_v46 = vsel %vm64_vm1, %v29_v41, %v22_v40 }
  0x11   :  { %v50_v47 = vadd.f32 %v49_v44, %v48_v38  ;;  %v57_v48 = vadd.f32 %v56_v45, %v55_v39  ;;  %v67_v49 = vsel %vm66_vm2, %v36_v42, %v65_v46 }
  0x12   :  { %v69_v50 = vsel %vm68_vm3, %v43_v43, %v67_v49 }
  0x13   :  { %v71_v51 = vsel %vm70_vm4, %v50_v47, %v69_v50 }
  0x14   :  { %v73_v52 = vsel %vm72_vm5, %v57_v48, %v71_v51 }
  0x15   :  { %75 = vst [vmem:[#allocation2] sm:$0x3f] %v73_v52 }
  0x16   :  { %102 = shalt.err (!%p99_p4)
}
  0x17   :  { %s103_s22 = scalar_lea.hbm %s157_s1, 128 }
  0x18   :  { %p104_p5 = scmp.ne.s32.totalorder %s157_s1, %s103_s22  ;;  %p107_p6 = scmp.lt.u32.totalorder %s103_s22, %s157_s1 }
  0x1a   :  { %p109_p7 = pnand %p107_p6, %p104_p5 }
  0x1c   :  { %112 = shalt.err (!%p109_p7)
}
  0x1d   :  { %85 = dma.vmem_to_hbm [thread:$0]  %s83_s18, 128, %s157_s1, [#allocation3]  }
  0x1e   :  { %113 = dma.done.wait [#allocation3], 128  }
  0x1f   :  { %114 = vsyncadd [#allocation3], 4294967168 }
  0x20   :  { %89 = vsyncpa [#allocation3], 1 }

// kernel: run.16
= control target key start
LH: loop header
LB: loop body
LE: loop exit
PB: predicated region body
PF: predicated region fallthrough
CT: control target
= control target key end

     0   :  { %v415_v0 = vmov 0   ;;  %s574_s2 = inlined_call_operand.vmem [shape: f32[12,1], index: 2, kind: input, shape index: {}]   ;;  %s575_s3 = inlined_call_operand.vmem [shape: f32[128,128], index: 3, kind: input, shape index: {}]   ;;  %s576_s4 = inlined_call_operand.vmem [shape: f32[128,128], index: 4, kind: input, shape index: {}]   ;;  %s577_s0 = inlined_call_operand.vmem [shape: f32[12,128], index: 0, kind: input, shape index: {}]   ;;  %s578_s1 = inlined_call_operand.vmem [shape: f32[12,128], index: 1, kind: input, shape index: {}]   ;;  %s579_s5 = inlined_call_operand.vmem [shape: f32[1,128], index: 5, kind: input, shape index: {}]   ;;  %s580_s6 = inlined_call_operand.vmem [shape: f32[12,128], index: 6, kind: output, shape index: {}]  }
   0x1   :  { %414 = vset.pattern.permute.xlu0 %v415_v0  ;;  %v25_v1 = vld [vmem:[%s574_s2] sm:$0xff]  ;;  %v26_v2 = vld [vmem:[%s574_s2 + $0x8] sm:$0xf]  ;;  %v43_v9 = vld [vmem:[%s575_s3 + $0x10] sm:$0xff] }
   0x2   :  { %v41_v3 = vld [vmem:[%s575_s3] sm:$0xff]  ;;  %29 = vperm.xlu0 %414, %v25_v1   ;;  %v42_v4 = vld [vmem:[%s575_s3 + $0x8] sm:$0xff]  ;;  %v44_v10 = vld [vmem:[%s575_s3 + $0x18] sm:$0xff] }
   0x3   :  { %v57_v5 = vld [vmem:[%s576_s4] sm:$0xff]  ;;  %v58_v6 = vld [vmem:[%s576_s4 + $0x8] sm:$0xff]  ;;  %v379_v7 = vpack.c.bf16 %v42_v4, %v41_v3  ;;  %v59_v11 = vld [vmem:[%s576_s4 + $0x10] sm:$0xff]  ;;  %v383_v12 = vpack.c.bf16 %v44_v10, %v43_v9 }
   0x4   :  { %v347_v8 = vpack.c.bf16 %v58_v6, %v57_v5  ;;  %v60_v13 = vld [vmem:[%s576_s4 + $0x18] sm:$0xff]  ;;  %v45_v14 = vld [vmem:[%s575_s3 + $0x20] sm:$0xff]  ;;  %v46_v15 = vld [vmem:[%s575_s3 + $0x28] sm:$0xff] }
   0x5   :  { %380 = vmatprep.subr.bf16.mxu0 %v379_v7  ;;  %v351_v16 = vpack.c.bf16 %v60_v13, %v59_v11  ;;  %v61_v17 = vld [vmem:[%s576_s4 + $0x20] sm:$0xff]  ;;  %v62_v18 = vld [vmem:[%s576_s4 + $0x28] sm:$0xff]  ;;  %v387_v19 = vpack.c.bf16 %v46_v15, %v45_v14  ;;  %v47_v21 = vld [vmem:[%s575_s3 + $0x30] sm:$0xff] }
   0x6   :  { %348 = vmatprep.subr.bf16.mxu1 %v347_v8  ;;  %34 = vperm.xlu0 %414, %v26_v2   ;;  %v355_v20 = vpack.c.bf16 %v62_v18, %v61_v17  ;;  %v48_v22 = vld [vmem:[%s575_s3 + $0x38] sm:$0xff]  ;;  %v63_v23 = vld [vmem:[%s576_s4 + $0x30] sm:$0xff]  ;;  %v49_v27 = vld [vmem:[%s575_s3 + $0x40] sm:$0xff] }
   0x7   :  { %382 = vmatpush3.bf16.msra.mxu0 %v379_v7  ;;  %350 = vmatpush3.bf16.msra.mxu1 %v347_v8  ;;  %v64_v24 = vld [vmem:[%s576_s4 + $0x38] sm:$0xff]  ;;  %v391_v25 = vpack.c.bf16 %v48_v22, %v47_v21  ;;  %v50_v28 = vld [vmem:[%s575_s3 + $0x48] sm:$0xff]  ;;  %v65_v29 = vld [vmem:[%s576_s4 + $0x40] sm:$0xff] }
   0x8   :  { %384 = vmatprep.subr.bf16.mxu0 %v383_v12  ;;  %352 = vmatprep.subr.bf16.mxu1 %v351_v16  ;;  %v359_v26 = vpack.c.bf16 %v64_v24, %v63_v23  ;;  %v66_v30 = vld [vmem:[%s576_s4 + $0x48] sm:$0xff]  ;;  %v39_v31 = vld [vmem:[%s577_s0] sm:$0xff]  ;;  %v395_v32 = vpack.c.bf16 %v50_v28, %v49_v27  ;;  %v51_v34 = vld [vmem:[%s575_s3 + $0x50] sm:$0xff] }
   0x9   :  { %344 = vmatprep.mubr.f32.mxu0 %v39_v31  ;;  %v363_v33 = vpack.c.bf16 %v66_v30, %v65_v29  ;;  %v52_v35 = vld [vmem:[%s575_s3 + $0x58] sm:$0xff]  ;;  %v67_v36 = vld [vmem:[%s576_s4 + $0x50] sm:$0xff]  ;;  %v53_v40 = vld [vmem:[%s575_s3 + $0x60] sm:$0xff] }
   0xa   :  { %v68_v37 = vld [vmem:[%s576_s4 + $0x58] sm:$0xff]  ;;  %v399_v38 = vpack.c.bf16 %v52_v35, %v51_v34  ;;  %v54_v41 = vld [vmem:[%s575_s3 + $0x68] sm:$0xff]  ;;  %v69_v42 = vld [vmem:[%s576_s4 + $0x60] sm:$0xff] }
   0xb   :  { %386 = vmatpush3.bf16.msra.mxu0 %v383_v12  ;;  %354 = vmatpush3.bf16.msra.mxu1 %v351_v16  ;;  %v367_v39 = vpack.c.bf16 %v68_v37, %v67_v36  ;;  %v70_v43 = vld [vmem:[%s576_s4 + $0x68] sm:$0xff]  ;;  %v403_v44 = vpack.c.bf16 %v54_v41, %v53_v40  ;;  %v55_v46 = vld [vmem:[%s575_s3 + $0x70] sm:$0xff]  ;;  %v56_v47 = vld [vmem:[%s575_s3 + $0x78] sm:$0xff] }
   0xc   :  { %388 = vmatprep.subr.bf16.mxu0 %v387_v19  ;;  %356 = vmatprep.subr.bf16.mxu1 %v355_v20  ;;  %v371_v45 = vpack.c.bf16 %v70_v43, %v69_v42  ;;  %v71_v48 = vld [vmem:[%s576_s4 + $0x70] sm:$0xff]  ;;  %v72_v49 = vld [vmem:[%s576_s4 + $0x78] sm:$0xff]  ;;  %v407_v50 = vpack.c.bf16 %v56_v47, %v55_v46  ;;  %v40_v52 = vld [vmem:[%s577_s0 + $0x8] sm:$0xf] }
   0xd   :  { %v375_v51 = vpack.c.bf16 %v72_v49, %v71_v48  ;;  %v23_v53 = vld [vmem:[%s578_s1] sm:$0xff]  ;;  %v24_v56 = vld [vmem:[%s578_s1 + $0x8] sm:$0xf] }
   0xe   :  { %v240_v62 = vld [vmem:[%s579_s5] ss:$0 sm:$0xff] }
   0xf   :  { %390 = vmatpush3.bf16.msra.mxu0 %v387_v19  ;;  %358 = vmatpush3.bf16.msra.mxu1 %v355_v20 }
  0x10   :  { %392 = vmatprep.subr.bf16.mxu0 %v391_v25  ;;  %360 = vmatprep.subr.bf16.mxu1 %v359_v26 }
  0x13   :  { %394 = vmatpush3.bf16.msra.mxu0 %v391_v25  ;;  %362 = vmatpush3.bf16.msra.mxu1 %v359_v26 }
  0x14   :  { %396 = vmatprep.subr.bf16.mxu0 %v395_v32  ;;  %364 = vmatprep.subr.bf16.mxu1 %v363_v33 }
  0x17   :  { %398 = vmatpush3.bf16.msra.mxu0 %v395_v32  ;;  %366 = vmatpush3.bf16.msra.mxu1 %v363_v33 }
  0x18   :  { %400 = vmatprep.subr.bf16.mxu0 %v399_v38  ;;  %368 = vmatprep.subr.bf16.mxu1 %v367_v39 }
  0x1b   :  { %402 = vmatpush3.bf16.msra.mxu0 %v399_v38  ;;  %370 = vmatpush3.bf16.msra.mxu1 %v367_v39 }
  0x1c   :  { %404 = vmatprep.subr.bf16.mxu0 %v403_v44  ;;  %372 = vmatprep.subr.bf16.mxu1 %v371_v45 }
  0x1f   :  { %406 = vmatpush3.bf16.msra.mxu0 %v403_v44  ;;  %374 = vmatpush3.bf16.msra.mxu1 %v371_v45 }
  0x20   :  { %408 = vmatprep.subr.bf16.mxu0 %v407_v50  ;;  %376 = vmatprep.subr.bf16.mxu1 %v375_v51 }
  0x23   :  { %410 = vmatpush3.bf16.msra.mxu0 %v407_v50  ;;  %378 = vmatpush3.bf16.msra.mxu1 %v375_v51 }
  0x26   :  { %345 = vmatmul.mubr.f32.vlgmr.msra.gmra.mrb[0].mxu0 %v40_v52 }
  0x81   :  { %v30_v54 = vpop.permute.xlu0 %29 }
  0x82   :  { %v37_v55 = vmul.f32 %v30_v54, %v23_v53 }
  0x84   :  { %309 = vmatprep.mubr.f32.mxu1 %v37_v55 }
  0x85   :  { %v35_v57 = vpop.permute.xlu0 %34 }
  0x86   :  { %v38_v58 = vmul.f32 %v35_v57, %v24_v56 }
  0x88   :  { %310 = vmatmul.mubr.f32.vlgmr.msra.gmra.mrb[0].mxu1 %v38_v58 }
  0xf9   :  { %v346_v59 = vpop.f32.mrb[0].mxu0 }
  0xfa   :  { %v214_v60 = vpop.f32.mrb[1].mxu0 }
 0x15b   :  { %v311_v61 = vpop.f32.mrb[0].mxu1 }
 0x15c   :  { %v220_v63 = vadd.f32 %v346_v59, %v311_v61  ;;  %v139_v0 = vpop.f32.mrb[1].mxu1 }
 0x15d   :  { %v215_v1 = vadd.f32 %v214_v60, %v139_v0 }
 0x15e   :  { %v231_v2 = vadd.f32 %v240_v62, %v220_v63 }
 0x15f   :  { %v230_v3 = vadd.f32 %v240_v62, %v215_v1 }
 0x160   :  { %v233_v4 = vmax.f32 %v231_v2, 0.0 }
 0x161   :  { %v232_v5 = vmax.f32 %v230_v3, 0.0 }
 0x162   :  { %235 = vst [vmem:[%s580_s6 + $0x8] sm:$0xf] %v233_v4 }
 0x163   :  { %234 = vst [vmem:[%s580_s6] sm:$0xff] %v232_v5 }

</bundles_post_ra>
